<compile_context>
chip_gen: v7x
topology: tpu7x:2x2x1
jax: 0.10.0
libtpu: 0.0.40
codegen_flags: <defaults>
</compile_context>

<pallas_src>
import jax
import jax.numpy as jnp
from jax import lax
from jax.experimental import pallas as pl
from jax.experimental.pallas import tpu as pltpu


def _round_up(x, m):
    return ((x + m - 1) // m) * m


def logreg_kernel(x_ref, w_ref, b_ref, o_ref):
    """Fused Linear + log_softmax(dim=-1) kernel.

    x_ref: (TB, F)      input-feature tile            (VMEM)
    w_ref: (Cp, F)      weight, native PyTorch layout (VMEM, replicated)
    b_ref: (1,  Cp)     bias (padded classes = -1e30) (VMEM, replicated)
    o_ref: (TB, Cp)     log-probabilities             (VMEM)
    """
    # Keep matmul operands in their native dtype (bf16 stays bf16 → full-rate MXU);
    # f32 accumulation comes from preferred_element_type, not from widening inputs.
    x = x_ref[...]                           # (TB, F)
    w = w_ref[...]                           # (Cp, F)
    b = b_ref[...].astype(jnp.float32)       # (1, Cp)

    # x @ w.T on the MXU via dot_general (contract F with F), f32 accumulation.
    logits = lax.dot_general(
        x, w,
        dimension_numbers=(((1,), (1,)), ((), ())),
        preferred_element_type=jnp.float32,
    ) + b                                    # (TB, Cp) f32

    # Numerically-stable log_softmax along the last axis (reductions → XLU,
    # exp/log → EUP; both are free slots alongside the load/MXU work).
    m = jnp.max(logits, axis=-1, keepdims=True)
    shifted = logits - m
    lse = jnp.log(jnp.sum(jnp.exp(shifted), axis=-1, keepdims=True))
    o_ref[...] = (shifted - lse).astype(o_ref.dtype)


def logreg_forward(seq, weight, bias, *, tile_b=1024):
    """seq: (B, F); weight: (C, F) [PyTorch layout]; bias: (C,)."""
    B, F = seq.shape
    C = weight.shape[0]

    # Lane-dense class dim: pad C up to a multiple of 128.
    C_pad = _round_up(max(C, 128), 128)
    # Batch tile: multiple of 8 sublanes, capped at `tile_b` (sized well under the
    # v7x 64 MiB VMEM even with double-buffering: tile_b*(F+C_pad)*4B per buffer).
    tb = min(tile_b, _round_up(B, 8))
    B_pad = _round_up(B, tb)

    x = seq if B_pad == B else jnp.pad(seq, ((0, B_pad - B), (0, 0)))
    if C_pad != C:
        w = jnp.pad(weight, ((0, C_pad - C), (0, 0)))                       # zero rows
        b = jnp.pad(bias, (0, C_pad - C), constant_values=-1e30)            # mask pads
    else:
        w, b = weight, bias
    b2d = b.reshape(1, C_pad)

    itemsize = jnp.dtype(seq.dtype).itemsize
    out = pl.pallas_call(
        logreg_kernel,
        out_shape=jax.ShapeDtypeStruct((B_pad, C_pad), seq.dtype),
        grid_spec=pltpu.PrefetchScalarGridSpec(
            num_scalar_prefetch=0,
            grid=(B_pad // tb,),
            in_specs=[
                pl.BlockSpec((tb, F), lambda i: (i, 0)),       # x: tiled over batch
                pl.BlockSpec((C_pad, F), lambda i: (0, 0)),    # weight: replicated
                pl.BlockSpec((1, C_pad), lambda i: (0, 0)),    # bias: replicated
            ],
            out_specs=pl.BlockSpec((tb, C_pad), lambda i: (i, 0)),
        ),
        compiler_params=pltpu.CompilerParams(
            dimension_semantics=("parallel",),                 # shard batch over TCs
            vmem_limit_bytes=64 * 1024 * 1024,
        ),
        cost_estimate=pl.CostEstimate(
            flops=2 * B_pad * F * C_pad,
            transcendentals=2 * B_pad * C_pad,
            bytes_accessed=(B_pad * F + C_pad * F + B_pad * C_pad) * itemsize,
        ),
    )(x, w, b2d)

    return out[:B, :C]


def init_logreg_params(key, ft_in, nb_classes, dtype=jnp.float32):
    """Matches LogReg.weights_init: xavier_uniform_ weight, zero bias."""
    bound = jnp.sqrt(6.0 / (ft_in + nb_classes)).astype(dtype)
    weight = jax.random.uniform(
        key, (nb_classes, ft_in), dtype=dtype, minval=-bound, maxval=bound
    )
    bias = jnp.zeros((nb_classes,), dtype=dtype)
    return weight, bias


if __name__ == "__main__":
    # TODO(synk): self.sigm (nn.Sigmoid) is defined in the module but never used in
    # forward(), so it is intentionally not implemented.
    key = jax.random.PRNGKey(0)
    k_x, k_w = jax.random.split(key)

    batch, ft_in, nb_classes = 8, 32, 16
    seq = jax.random.normal(k_x, (batch, ft_in), dtype=jnp.float32)
    weight, bias = init_logreg_params(k_w, ft_in, nb_classes)

    out = logreg_forward(seq, weight, bias)
    jax.block_until_ready(out)

    # Reference check in plain JAX (same math as torch.log_softmax(fc(seq))).
    ref = jax.nn.log_softmax(seq @ weight.T + bias, axis=-1)
    assert out.shape == (batch, nb_classes)
    assert jnp.allclose(out, ref, atol=1e-5, rtol=1e-5)

    print("KERNEL_OK")
</pallas_src>

<mosaic_0001>
module attributes {stable_mosaic.version = 11 : i64} {
  func.func @logreg_kernel(%arg0: i32, %arg1: memref<8x32xf32, #tpu.memory_space<vmem>>, %arg2: memref<128x32xf32, #tpu.memory_space<vmem>>, %arg3: memref<1x128xf32, #tpu.memory_space<vmem>>, %arg4: memref<8x128xf32, #tpu.memory_space<vmem>>) attributes {dimension_semantics = [#tpu.dimension_semantics<parallel>], iteration_bounds = array<i64: 1>, scalar_prefetch = 0 : i64, scratch_operands = 0 : i64, tpu.core_type = #tpu.core_type<tc>, window_params = [{transform_indices = @transform_0, window_bounds = array<i64: 8, 32>}, {pipeline_mode = #tpu.pipeline_mode<synchronous>, transform_indices = @transform_1, window_bounds = array<i64: 128, 32>}, {pipeline_mode = #tpu.pipeline_mode<synchronous>, transform_indices = @transform_2, window_bounds = array<i64: 1, 128>}, {transform_indices = @transform_3, window_bounds = array<i64: 8, 128>}]} {
    %c0 = arith.constant 0 : index
    %c0_0 = arith.constant 0 : index
    %0 = vector.load %arg1[%c0, %c0_0] : memref<8x32xf32, #tpu.memory_space<vmem>>, vector<8x32xf32>
    %c0_1 = arith.constant 0 : index
    %c0_2 = arith.constant 0 : index
    %1 = vector.load %arg2[%c0_1, %c0_2] : memref<128x32xf32, #tpu.memory_space<vmem>>, vector<128x32xf32>
    %c0_3 = arith.constant 0 : index
    %c0_4 = arith.constant 0 : index
    %2 = vector.load %arg3[%c0_3, %c0_4] : memref<1x128xf32, #tpu.memory_space<vmem>>, vector<1x128xf32>
    %cst = arith.constant dense<0.000000e+00> : vector<8x128xf32>
    %3 = tpu.matmul %0, %1, %cst {dimension_numbers = #tpu.dot_dimension_numbers<[1], [1], [0], [0], [0, 0, 1, 0], [], []>} : vector<8x32xf32>, vector<128x32xf32>, vector<8x128xf32> -> vector<8x128xf32>
    %4 = vector.broadcast %2 : vector<1x128xf32> to vector<8x128xf32>
    %5 = arith.addf %3, %4 : vector<8x128xf32>
    %cst_5 = arith.constant dense<0xFF800000> : vector<8xf32>
    %6 = vector.multi_reduction <maximumf>, %5, %cst_5 [1] : vector<8x128xf32> to vector<8xf32>
    %7 = vector.shape_cast %6 : vector<8xf32> to vector<8x1xf32>
    %8 = vector.broadcast %7 : vector<8x1xf32> to vector<8x128xf32>
    %9 = arith.subf %5, %8 : vector<8x128xf32>
    %10 = math.exp %9 : vector<8x128xf32>
    %cst_6 = arith.constant dense<0.000000e+00> : vector<8xf32>
    %11 = vector.multi_reduction <add>, %10, %cst_6 [1] : vector<8x128xf32> to vector<8xf32>
    %12 = vector.shape_cast %11 : vector<8xf32> to vector<8x1xf32>
    %13 = math.log %12 : vector<8x1xf32>
    %14 = vector.broadcast %13 : vector<8x1xf32> to vector<8x128xf32>
    %15 = arith.subf %9, %14 : vector<8x128xf32>
    %c0_7 = arith.constant 0 : index
    %c0_8 = arith.constant 0 : index
    %16 = vector.load %arg4[%c0_7, %c0_8] : memref<8x128xf32, #tpu.memory_space<vmem>>, vector<8x128xf32>
    tpu.vector_store %arg4[%c0_7, %c0_8], %15 {strides = array<i32>} : memref<8x128xf32, #tpu.memory_space<vmem>>, vector<8x128xf32>,
    return
  }
  func.func @transform_0(%arg0: i32) -> (i32, i32) {
    %c0_i32 = arith.constant 0 : i32
    %c0_i32_0 = arith.constant 0 : i32
    return %arg0, %c0_i32 : i32, i32
  }
  func.func @transform_1(%arg0: i32) -> (i32, i32) {
    %c0_i32 = arith.constant 0 : i32
    %c0_i32_0 = arith.constant 0 : i32
    %c0_i32_1 = arith.constant 0 : i32
    return %c0_i32, %c0_i32_0 : i32, i32
  }
  func.func @transform_2(%arg0: i32) -> (i32, i32) {
    %c0_i32 = arith.constant 0 : i32
    %c0_i32_0 = arith.constant 0 : i32
    %c0_i32_1 = arith.constant 0 : i32
    return %c0_i32, %c0_i32_0 : i32, i32
  }
  func.func @transform_3(%arg0: i32) -> (i32, i32) {
    %c0_i32 = arith.constant 0 : i32
    %c0_i32_0 = arith.constant 0 : i32
    return %arg0, %c0_i32 : i32, i32
  }
}

</mosaic_0001>

<bundles_post_ra>
// kernel: tpu_custom_call.1
= control target key start
LH: loop header
LB: loop body
LE: loop exit
PB: predicated region body
PF: predicated region fallthrough
CT: control target
= control target key end

     0   :  { %8 = vsyncpa [#allocation3], 0  ;;  %s534_s0 = inlined_call_operand.hbm [shape: f32[8,32], index: 0, kind: input, shape index: {}]   ;;  %s535_s1 = inlined_call_operand.hbm [shape: f32[128,32], index: 1, kind: input, shape index: {}]   ;;  %s536_s2 = inlined_call_operand.hbm [shape: f32[1,128], index: 2, kind: input, shape index: {}]   ;;  %s537_s3 = inlined_call_operand.hbm [shape: f32[8,128], index: 3, kind: output, shape index: {}]  }
   0x1   :  { %9 = vsyncpa [#allocation6], 0 }
   0x2   :  { %10 = vsyncpa [#allocation4], 0  ;;  %s434_s12 = smov [#allocation5]   ;;  %s340_s16 = scalar_lea.hbm %s535_s1, 2048 }
   0x3   :  { %s26_s13 = sshll.u32 %s434_s12, 4  ;;  %p341_p0 = scmp.ne.s32.totalorder %s535_s1, %s340_s16  ;;  %s27_s13 = int_to_ptr.vmem [resolvable:$true] %s26_s13 }
   0x4   :  { %p344_p1 = scmp.lt.u32.totalorder %s340_s16, %s535_s1 }
   0x6   :  { %p346_p2 = pnand %p344_p1, %p341_p0 }
   0x8   :  { %349 = shalt.err (!%p346_p2)
}
   0x9   :  { %s350_s21 = scalar_lea.vmem %s27_s13, 2048  ;;  %p355_p4 = scmp.lt.s32.totalorder %s27_s13, %s27_s13 }
   0xa   :  { %p351_p3 = scmp.ne.s32.totalorder %s27_s13, %s350_s21  ;;  %p356_p5 = scmp.lt.s32.totalorder %s350_s21, %s350_s21 }
   0xc   :  { %p357_p6 = por %p356_p5, %p355_p4 }
   0xe   :  { %p358_p7 = pnand %p357_p6, %p351_p3 }
  0x10   :  { %361 = shalt.err (!%p358_p7)
}
  0x11   :  { %s435_s22 = smov 128   ;;  %s436_s23 = smov 8  }
  0x12   :  { %32 = dma.hbm_to_vmem [thread:$0]  %s535_s1, 2048, %s27_s13, [#allocation6], %s435_s22, %s435_s22, %s436_s23  }
  0x13   :  { %s437_s26 = smov [#allocation2]   ;;  %s438_s28 = smov [#allocation7]  }
  0x14   :  { %s17_s27 = sshll.u32 %s437_s26, 4  ;;  %s39_s29 = sshll.u32 %s438_s28, 4  ;;  %s18_s27 = int_to_ptr.vmem [resolvable:$true] %s17_s27  ;;  %s40_s29 = int_to_ptr.vmem [resolvable:$true] %s39_s29 }
  0x15   :  { %s362_s5 = scalar_lea.hbm %s534_s0, 128 }
  0x16   :  { %p363_p8 = scmp.ne.s32.totalorder %s534_s0, %s362_s5  ;;  %p366_p9 = scmp.lt.u32.totalorder %s362_s5, %s534_s0 }
  0x18   :  { %p368_p10 = pnand %p366_p9, %p363_p8 }
  0x1a   :  { %371 = shalt.err (!%p368_p10)
}
  0x1b   :  { %s372_s1 = scalar_lea.vmem %s18_s27, 128  ;;  %p377_p12 = scmp.lt.s32.totalorder %s18_s27, %s18_s27 }
  0x1c   :  { %p373_p11 = scmp.ne.s32.totalorder %s18_s27, %s372_s1  ;;  %p378_p13 = scmp.lt.s32.totalorder %s372_s1, %s372_s1 }
  0x1e   :  { %p379_p0 = por %p378_p13, %p377_p12 }
  0x20   :  { %p380_p1 = pnand %p379_p0, %p373_p11 }
  0x22   :  { %383 = shalt.err (!%p380_p1)
}
  0x23   :  { %20 = dma.hbm_to_vmem [thread:$0]  %s534_s0, 128, %s18_s27, [#allocation3]  }
  0x24   :  { %s384_s14 = scalar_lea.hbm %s536_s2, 16 }
  0x25   :  { %p385_p2 = scmp.ne.s32.totalorder %s536_s2, %s384_s14  ;;  %p388_p3 = scmp.lt.u32.totalorder %s384_s14, %s536_s2 }
  0x27   :  { %p390_p4 = pnand %p388_p3, %p385_p2 }
  0x29   :  { %393 = shalt.err (!%p390_p4)
}
  0x2a   :  { %s394_s19 = scalar_lea.vmem %s40_s29, 16  ;;  %s398_s20 = scalar_lea.vmem %s40_s29, 32 }
  0x2b   :  { %p395_p5 = scmp.ne.s32.totalorder %s40_s29, %s394_s19  ;;  %p399_p6 = scmp.lt.s32.totalorder %s40_s29, %s40_s29 }
  0x2c   :  { %p400_p7 = scmp.lt.s32.totalorder %s398_s20, %s394_s19 }
  0x2e   :  { %p401_p8 = por %p400_p7, %p399_p6 }
  0x30   :  { %p402_p9 = pnand %p401_p8, %p395_p5 }
  0x32   :  { %405 = shalt.err (!%p402_p9)
}
  0x33   :  { %42 = dma.hbm_to_vmem [thread:$0]  %s536_s2, 16, %s40_s29, [#allocation6]  }
  0x34   :  { %428 = dma.done.wait [#allocation3], 128  }
  0x35   :  { %429 = vsyncadd [#allocation3], 4294967168 }
  0x36   :  { %430 = dma.done.wait [#allocation6], 2064  }
  0x37   :  { %431 = vsyncadd [#allocation6], 4294965232  ;;  %v439_v0 = vmov 0.0|0.0   ;;  %vm440_vm0 = vmmov 0   ;;  %v441_v1 = vmov 0.0   ;;  %vm76_vm1 = vcmask 261120  }
  0x38   :  { %295 = vmatprep.subr.bf16.mxu0 %v439_v0  ;;  %292 = vmatprep.mubr.msk.f32.mxu0 %vm440_vm0, %v441_v1  ;;  %v53_v2 = vld [vmem:[#allocation5] sm:$0xff]  ;;  %v54_v3 = vld [vmem:[#allocation5 + $0x8] sm:$0xff]  ;;  %vm501_vm2 = vmpackc.low %vm76_vm1, %vm76_vm1  ;;  %s442_s2 = smov [#allocation8]  }
  0x39   :  { %v296_v5 = vpack.c.bf16 %v54_v3, %v53_v2  ;;  %v55_v6 = vld [vmem:[#allocation5 + $0x10] sm:$0xff]  ;;  %v56_v7 = vld [vmem:[#allocation5 + $0x18] sm:$0xff]  ;;  %v57_v9 = vld [vmem:[#allocation5 + $0x20] sm:$0xff]  ;;  %s215_s22 = sshll.u32 %s442_s2, 4  ;;  %s216_s22 = int_to_ptr.vmem [resolvable:$true] %s215_s22 }
  0x3a   :  { %v300_v8 = vpack.c.bf16 %v56_v7, %v55_v6  ;;  %v58_v10 = vld [vmem:[#allocation5 + $0x28] sm:$0xff]  ;;  %v59_v12 = vld [vmem:[#allocation5 + $0x30] sm:$0xff]  ;;  %v60_v13 = vld [vmem:[#allocation5 + $0x38] sm:$0xff]  ;;  %s406_s23 = scalar_lea.vmem %s216_s22, 128  ;;  %p411_p11 = scmp.lt.s32.totalorder %s216_s22, %s216_s22 }
  0x3b   :  { %298 = vmatpush3.bf16.xpose.msk.msra.mxu0 %vm501_vm2, %v296_v5  ;;  %v304_v11 = vpack.c.bf16 %v58_v10, %v57_v9  ;;  %v308_v14 = vpack.c.bf16 %v60_v13, %v59_v12  ;;  %v61_v15 = vld [vmem:[#allocation5 + $0x40] sm:$0xff]  ;;  %v62_v16 = vld [vmem:[#allocation5 + $0x48] sm:$0xff]  ;;  %v63_v18 = vld [vmem:[#allocation5 + $0x50] sm:$0xff]  ;;  %p407_p10 = scmp.ne.s32.totalorder %s216_s22, %s406_s23  ;;  %p412_p12 = scmp.lt.s32.totalorder %s406_s23, %s406_s23 }
  0x3c   :  { %299 = vmatprep.subr.bf16.mxu0 %v439_v0  ;;  %v312_v17 = vpack.c.bf16 %v62_v16, %v61_v15  ;;  %v64_v19 = vld [vmem:[#allocation5 + $0x58] sm:$0xff]  ;;  %v65_v21 = vld [vmem:[#allocation5 + $0x60] sm:$0xff]  ;;  %v66_v22 = vld [vmem:[#allocation5 + $0x68] sm:$0xff] }
  0x3d   :  { %v316_v20 = vpack.c.bf16 %v64_v19, %v63_v18  ;;  %v320_v23 = vpack.c.bf16 %v66_v22, %v65_v21  ;;  %v67_v24 = vld [vmem:[#allocation5 + $0x70] sm:$0xff]  ;;  %v68_v25 = vld [vmem:[#allocation5 + $0x78] sm:$0xff]  ;;  %v225_v28 = vld [vmem:[#allocation7] ss:$0 sm:$0xff]  ;;  %p413_p13 = por %p412_p12, %p411_p11 }
  0x3e   :  { %v324_v26 = vpack.c.bf16 %v68_v25, %v67_v24  ;;  %v52_v27 = vld [vmem:[#allocation2] sm:$0xff] }
  0x3f   :  { %p414_p0 = pnand %p413_p13, %p407_p10 }
  0x43   :  { %302 = vmatpush3.bf16.xpose.msk.msra.mxu0 %vm501_vm2, %v300_v8 }
  0x44   :  { %303 = vmatprep.subr.bf16.mxu0 %v439_v0 }
  0x4b   :  { %306 = vmatpush3.bf16.xpose.msk.msra.mxu0 %vm501_vm2, %v304_v11 }
  0x4c   :  { %307 = vmatprep.subr.bf16.mxu0 %v439_v0 }
  0x53   :  { %310 = vmatpush3.bf16.xpose.msk.msra.mxu0 %vm501_vm2, %v308_v14 }
  0x54   :  { %311 = vmatprep.subr.bf16.mxu0 %v439_v0 }
  0x5b   :  { %314 = vmatpush3.bf16.xpose.msk.msra.mxu0 %vm501_vm2, %v312_v17 }
  0x5c   :  { %315 = vmatprep.subr.bf16.mxu0 %v439_v0 }
  0x63   :  { %318 = vmatpush3.bf16.xpose.msk.msra.mxu0 %vm501_vm2, %v316_v20 }
  0x64   :  { %319 = vmatprep.subr.bf16.mxu0 %v439_v0 }
  0x6b   :  { %322 = vmatpush3.bf16.xpose.msk.msra.mxu0 %vm501_vm2, %v320_v23 }
  0x6c   :  { %323 = vmatprep.subr.bf16.mxu0 %v439_v0 }
  0x73   :  { %326 = vmatpush3.bf16.xpose.msk.msra.mxu0 %vm501_vm2, %v324_v26 }
  0x7a   :  { %293 = vmatmul.mubr.msk.f32.vlgmr.msra.gmra.mrb[0].mxu0 %vm76_vm1, %v52_v27 }
 0x14d   :  { %v194_v29 = vpop.f32.mrb[0].mxu0 }
 0x14e   :  { %v195_v30 = vadd.f32 %v225_v28, %v194_v29  ;;  %v294_v31 = vpop.f32.mrb[1].mxu0 }
 0x150   :  { %198 = vmax.xlane.f32.xlu0 %v195_v30 }
 0x1dd   :  { %v199_v32 = vpop.xlane.xlu0 %198 }
 0x1de   :  { %v200_v33 = vsub.f32 %v195_v30, %v199_v32 }
 0x1e0   :  { %v201_v34 = vmul.f32 1.442695, %v200_v33 }
 0x1e2   :  { %336 = vpow2.f32 %v201_v34 }
 0x1ec   :  { %v337_v35 = vpop.eup %336 }
 0x1ed   :  { %203 = vadd.xlane.f32.xlu0 %v337_v35 }
 0x27a   :  { %v204_v36 = vpop.xlane.xlu0 %203 }
 0x27b   :  { %338 = vlog2.f32 %v204_v36 }
 0x285   :  { %v339_v37 = vpop.eup %338 }
 0x286   :  { %v206_v38 = vmul.f32 0.6931472, %v339_v37 }
 0x288   :  { %v207_v39 = vsub.f32 %v200_v33, %v206_v38 }
 0x28a   :  { %208 = vst [vmem:[#allocation8] sm:$0xff] %v207_v39 }
 0x28b   :  { %417 = shalt.err (!%p414_p0)
}
 0x28c   :  { %s418_s26 = scalar_lea.hbm %s537_s3, 128 }
 0x28d   :  { %p419_p1 = scmp.ne.s32.totalorder %s537_s3, %s418_s26  ;;  %p422_p2 = scmp.lt.u32.totalorder %s418_s26, %s537_s3 }
 0x28f   :  { %p424_p3 = pnand %p422_p2, %p419_p1 }
 0x291   :  { %427 = shalt.err (!%p424_p3)
}
 0x292   :  { %218 = dma.vmem_to_hbm [thread:$0]  %s216_s22, 128, %s537_s3, [#allocation4]  }
 0x293   :  { %432 = dma.done.wait [#allocation4], 128  }
 0x294   :  { %433 = vsyncadd [#allocation4], 4294967168 }
 0x295   :  { %222 = vsyncpa [#allocation3], 1 }
 0x296   :  { %223 = vsyncpa [#allocation6], 1 }
 0x297   :  { %224 = vsyncpa [#allocation4], 1 }

</bundles_post_ra>
